<compile_context>
chip_gen: v6e
topology: v6e:2x2x1
jax: 0.10.0
libtpu: 0.0.40
codegen_flags: <defaults>
</compile_context>

<pallas_src>
import functools

import jax
import jax.numpy as jnp
from jax.experimental import pallas as pl
from jax.experimental.pallas import tpu as pltpu

EPS = 1e-5  # torch BatchNorm default

# Set to jnp.bfloat16 on v6e/v7x to halve matmul-input bytes (BN/stat math stays f32).
# Kept f32 by default to match the PyTorch reference numerics as closely as possible.
MATMUL_DTYPE = jnp.float32


# ----------------------------------------------------------------------------- helpers

def _row_tile(p, cap=512):
    """Largest row-tile that is a multiple of 8, divides p, and is <= cap."""
    if p % 8 != 0:
        return p  # full block (== array dim) is always a legal block shape
    tp = min(p, cap)
    while p % tp != 0:
        tp -= 8
    return tp


def _bn_apply(x, stats, gamma, beta, count, relu):
    """Apply batch-stat BN (+ optional ReLU) given accumulated (sum, sumsq) stats."""
    mean = stats[0:1, :] / count
    var = stats[1:2, :] / count - mean * mean           # biased variance (torch BN)
    scale = gamma * jax.lax.rsqrt(var + EPS)
    shift = beta - mean * scale
    y = x * scale + shift
    return jnp.maximum(y, 0.0) if relu else y


def _accum_stats(stats_ref, y):
    """Accumulate per-channel sum / sumsq of y into a VMEM-resident (2, C) output."""
    part = jnp.concatenate(
        [jnp.sum(y, axis=0, keepdims=True), jnp.sum(y * y, axis=0, keepdims=True)],
        axis=0)

    @pl.when(pl.program_id(0) == 0)
    def _():
        stats_ref[...] = part

    @pl.when(pl.program_id(0) != 0)
    def _():
        stats_ref[...] += part


# ----------------------------------------------------------------------------- kernels

def _layer_kernel(*refs, count, norm_input, relu_input, has_bias,
                  collect_stats, final_log_softmax, compute_dtype):
    """Fused: [BN(+ReLU) of input from prev-layer stats] -> matmul -> [bias]
    -> [log_softmax] ; writes raw output tile and accumulates this layer's stats."""
    it = iter(refs)
    x_ref = next(it)
    if norm_input:
        s_ref, g_ref, be_ref = next(it), next(it), next(it)
    w_ref = next(it)
    if has_bias:
        bias_ref = next(it)
    o_ref = next(it)
    if collect_stats:
        stats_ref = next(it)

    x = x_ref[...].astype(jnp.float32)
    if norm_input:
        x = _bn_apply(x, s_ref[...], g_ref[...], be_ref[...], count, relu_input)

    c_in = x.shape[1]
    if c_in <= 4:
        # Tiny-K projection: VPU broadcast-FMA instead of a K=3 MXU matmul.
        w = w_ref[...].astype(jnp.float32)
        y = x[:, 0:1] * w[0:1, :]
        for k in range(1, c_in):
            y = y + x[:, k:k + 1] * w[k:k + 1, :]
    else:
        y = jnp.dot(x.astype(compute_dtype), w_ref[...].astype(compute_dtype),
                    preferred_element_type=jnp.float32)

    if has_bias:
        y = y + bias_ref[...]

    if final_log_softmax:
        m = jnp.max(y, axis=-1, keepdims=True)
        s = y - m
        y = s - jnp.log(jnp.sum(jnp.exp(s), axis=-1, keepdims=True))

    o_ref[...] = y
    if collect_stats:
        _accum_stats(stats_ref, y)


def _pt_feat1_kernel(x_ref, t_ref, w_ref, o_ref, stats_ref):
    """Fused per-point 3x3 transform (torch.bmm) + feat conv1 (3->64), all VPU FMAs."""
    x = x_ref[...]                      # (tp, 3)
    tm = t_ref[...]                     # (tp, 9) row-major per-point 3x3
    xt = (x[:, 0:1] * tm[:, 0:3] +
          x[:, 1:2] * tm[:, 3:6] +
          x[:, 2:3] * tm[:, 6:9])       # (tp, 3)
    w = w_ref[...]                      # (3, 64)
    y = (xt[:, 0:1] * w[0:1, :] +
         xt[:, 1:2] * w[1:2, :] +
         xt[:, 2:3] * w[2:3, :])        # (tp, 64), conv bias dropped (BN follows)
    o_ref[...] = y
    _accum_stats(stats_ref, y)


def _head_c1_kernel(pf_ref, pfs_ref, pfg_ref, pfb_ref,
                    gl_ref, gls_ref, glg_ref, glb_ref,
                    wp_ref, wg_ref, o_ref, stats_ref, *, count, compute_dtype):
    """Head conv1 as a K-split of the (1088->512) matmul:
       relu(bn1_feat(pointfeat)) @ W_p + bn3_feat(glob) @ W_g
    which is exactly conv1(cat([glob, pointfeat], 1)) with the bias dropped (BN follows).
    """
    pf = _bn_apply(pf_ref[...].astype(jnp.float32), pfs_ref[...],
                   pfg_ref[...], pfb_ref[...], count, relu=True)
    gl = _bn_apply(gl_ref[...].astype(jnp.float32), gls_ref[...],
                   glg_ref[...], glb_ref[...], count, relu=False)
    cd = compute_dtype
    y = jnp.dot(gl.astype(cd), wg_ref[...].astype(cd), preferred_element_type=jnp.float32)
    y = y + jnp.dot(pf.astype(cd), wp_ref[...].astype(cd), preferred_element_type=jnp.float32)
    o_ref[...] = y
    _accum_stats(stats_ref, y)


# ----------------------------------------------------------------------------- wrappers

def layer(x, w, *, bias=None, in_stats=None, in_gamma=None, in_beta=None,
          relu_input=False, collect_stats=False, final_log_softmax=False,
          row_tile_cap=512):
    """(P, Cin) -> (P, Cout) raw output (and optional (2, Cout) sum/sumsq stats)."""
    n_rows, c_in = x.shape
    c_out = w.shape[1]
    tp = _row_tile(n_rows, row_tile_cap)
    grid = (n_rows // tp,)
    norm_input = in_stats is not None
    has_bias = bias is not None

    inputs = [x]
    in_specs = [pl.BlockSpec((tp, c_in), lambda i: (i, 0))]
    if norm_input:
        inputs += [in_stats, in_gamma, in_beta]
        in_specs += [pl.BlockSpec((2, c_in), lambda i: (0, 0)),
                     pl.BlockSpec((1, c_in), lambda i: (0, 0)),
                     pl.BlockSpec((1, c_in), lambda i: (0, 0))]
    inputs.append(w)
    in_specs.append(pl.BlockSpec((c_in, c_out), lambda i: (0, 0)))
    if has_bias:
        inputs.append(bias.reshape(1, c_out))
        in_specs.append(pl.BlockSpec((1, c_out), lambda i: (0, 0)))

    out_shape = [jax.ShapeDtypeStruct((n_rows, c_out), jnp.float32)]
    out_specs = [pl.BlockSpec((tp, c_out), lambda i: (i, 0))]
    if collect_stats:
        out_shape.append(jax.ShapeDtypeStruct((2, c_out), jnp.float32))
        out_specs.append(pl.BlockSpec((2, c_out), lambda i: (0, 0)))

    kernel = functools.partial(
        _layer_kernel, count=float(n_rows), norm_input=norm_input,
        relu_input=relu_input, has_bias=has_bias, collect_stats=collect_stats,
        final_log_softmax=final_log_softmax, compute_dtype=MATMUL_DTYPE)

    # Stats accumulation keeps a resident output across the row grid => 'arbitrary'.
    sem = ("arbitrary",) if collect_stats else ("parallel",)
    out = pl.pallas_call(
        kernel,
        grid=grid,
        in_specs=in_specs,
        out_specs=tuple(out_specs) if collect_stats else out_specs[0],
        out_shape=tuple(out_shape) if collect_stats else out_shape[0],
        compiler_params=pltpu.CompilerParams(dimension_semantics=sem),
    )(*inputs)
    return out


def point_transform_conv1(x_pts, trans_flat, w, *, row_tile_cap=512):
    """Fused torch.bmm(points, trans) + feat conv1 (3->64); returns raw out + stats."""
    n_rows = x_pts.shape[0]
    c_out = w.shape[1]
    tp = _row_tile(n_rows, row_tile_cap)
    grid = (n_rows // tp,)
    return pl.pallas_call(
        _pt_feat1_kernel,
        grid=grid,
        in_specs=[pl.BlockSpec((tp, 3), lambda i: (i, 0)),
                  pl.BlockSpec((tp, 9), lambda i: (i, 0)),
                  pl.BlockSpec((3, c_out), lambda i: (0, 0))],
        out_specs=(pl.BlockSpec((tp, c_out), lambda i: (i, 0)),
                   pl.BlockSpec((2, c_out), lambda i: (0, 0))),
        out_shape=(jax.ShapeDtypeStruct((n_rows, c_out), jnp.float32),
                   jax.ShapeDtypeStruct((2, c_out), jnp.float32)),
        compiler_params=pltpu.CompilerParams(dimension_semantics=("arbitrary",)),
    )(x_pts, trans_flat, w)


def head_conv1(pf_raw, pf_stats, pf_gamma, pf_beta,
               gl_raw, gl_stats, gl_gamma, gl_beta,
               wp, wg, *, row_tile_cap=512):
    """Head conv1 (1088->512) via K-split; avoids materializing the (P,1088) concat."""
    n_rows, c_pf = pf_raw.shape
    c_gl = gl_raw.shape[1]
    c_out = wp.shape[1]
    tp = _row_tile(n_rows, row_tile_cap)
    grid = (n_rows // tp,)
    kernel = functools.partial(_head_c1_kernel, count=float(n_rows),
                               compute_dtype=MATMUL_DTYPE)
    return pl.pallas_call(
        kernel,
        grid=grid,
        in_specs=[pl.BlockSpec((tp, c_pf), lambda i: (i, 0)),
                  pl.BlockSpec((2, c_pf), lambda i: (0, 0)),
                  pl.BlockSpec((1, c_pf), lambda i: (0, 0)),
                  pl.BlockSpec((1, c_pf), lambda i: (0, 0)),
                  pl.BlockSpec((tp, c_gl), lambda i: (i, 0)),
                  pl.BlockSpec((2, c_gl), lambda i: (0, 0)),
                  pl.BlockSpec((1, c_gl), lambda i: (0, 0)),
                  pl.BlockSpec((1, c_gl), lambda i: (0, 0)),
                  pl.BlockSpec((c_pf, c_out), lambda i: (0, 0)),
                  pl.BlockSpec((c_gl, c_out), lambda i: (0, 0))],
        out_specs=(pl.BlockSpec((tp, c_out), lambda i: (i, 0)),
                   pl.BlockSpec((2, c_out), lambda i: (0, 0))),
        out_shape=(jax.ShapeDtypeStruct((n_rows, c_out), jnp.float32),
                   jax.ShapeDtypeStruct((2, c_out), jnp.float32)),
        compiler_params=pltpu.CompilerParams(dimension_semantics=("arbitrary",)),
    )(pf_raw, pf_stats, pf_gamma, pf_beta, gl_raw, gl_stats, gl_gamma, gl_beta, wp, wg)


# ----------------------------------------------------------------------------- params

def init_params(key, k_classes=2):
    keys = iter(jax.random.split(key, 64))

    def nrm(shape, scale=0.1):
        return scale * jax.random.normal(next(keys), shape, jnp.float32)

    def bn(c):
        return 1.0 + nrm((1, c)), nrm((1, c))

    # Conv/Linear biases of BN-followed layers are omitted on purpose: with batch-stat
    # BatchNorm they are exact no-ops on the forward output.
    stn = {"c1w": nrm((3, 64)), "c2w": nrm((64, 128)), "c3w": nrm((128, 1024)),
           "f1w": nrm((1024, 512)), "f2w": nrm((512, 256)),
           "f3w": nrm((256, 9)), "f3b": nrm((1, 9))}
    stn["bn1g"], stn["bn1b"] = bn(64)
    stn["bn2g"], stn["bn2b"] = bn(128)
    stn["bn3g"], stn["bn3b"] = bn(1024)
    stn["bn4g"], stn["bn4b"] = bn(512)
    stn["bn5g"], stn["bn5b"] = bn(256)

    feat = {"c1w": nrm((3, 64)), "c2w": nrm((64, 128)), "c3w": nrm((128, 1024))}
    feat["bn1g"], feat["bn1b"] = bn(64)
    feat["bn2g"], feat["bn2b"] = bn(128)
    feat["bn3g"], feat["bn3b"] = bn(1024)

    head = {"c1wg": nrm((1024, 512)),   # rows of the 1088-wide conv1 weight for glob
            "c1wp": nrm((64, 512)),     # rows for pointfeat
            "c2w": nrm((512, 256)), "c3w": nrm((256, 128)),
            "c4w": nrm((128, k_classes)), "c4b": nrm((1, k_classes))}
    head["bn1g"], head["bn1b"] = bn(512)
    head["bn2g"], head["bn2b"] = bn(256)
    head["bn3g"], head["bn3b"] = bn(128)

    return {"stn": stn, "feat": feat, "head": head}


# ----------------------------------------------------------------------------- forward

def pointnet_densecls_forward(params, x, k_classes=2):
    b, c, t, n = x.shape
    assert c == 3, "PointNetfeat(in_d=3) expects 3 input channels"
    # the original `view(batchsize, n_pts, k)` requires the trailing spatial dim == 1
    assert n == 1, "PointNetDenseCls forward is only shape-consistent for n == 1"
    # TODO(synk): for n > 1 a group-max kernel over n would be needed before the
    # fc / head stages, but the torch module's final view is inconsistent there anyway.
    num_pts = b * t * n

    x_pts = jnp.transpose(x, (0, 2, 3, 1)).reshape(num_pts, 3)   # (P, 3), (b,t,n) order
    sp, fp, hp = params["stn"], params["feat"], params["head"]

    # ---------------- STN3d: per-(b,t) 3x3 transform ----------------
    h1, s1 = layer(x_pts, sp["c1w"], collect_stats=True)
    h2, s2 = layer(h1, sp["c2w"], in_stats=s1, in_gamma=sp["bn1g"], in_beta=sp["bn1b"],
                   relu_input=True, collect_stats=True)
    h3, s3 = layer(h2, sp["c3w"], in_stats=s2, in_gamma=sp["bn2g"], in_beta=sp["bn2b"],
                   relu_input=True, collect_stats=True)
    # torch.max(x, -1)[0] over n == 1 is an identity; bn3+relu applied lazily in fc1.
    f1, t1 = layer(h3, sp["f1w"], in_stats=s3, in_gamma=sp["bn3g"], in_beta=sp["bn3b"],
                   relu_input=True, collect_stats=True)
    f2, t2 = layer(f1, sp["f2w"], in_stats=t1, in_gamma=sp["bn4g"], in_beta=sp["bn4b"],
                   relu_input=True, collect_stats=True)
    iden = jnp.eye(3, dtype=jnp.float32).reshape(1, 9)           # "+ iden" folded into bias
    trans = layer(f2, sp["f3w"], bias=sp["f3b"] + iden,
                  in_stats=t2, in_gamma=sp["bn5g"], in_beta=sp["bn5b"], relu_input=True)

    # ---------------- PointNetfeat ----------------
    # n == 1 => per-(b,t) transform rows align 1:1 with point rows.
    pf_raw, fs1 = point_transform_conv1(x_pts, trans, fp["c1w"])   # raw pointfeat (P,64)
    g2, fs2 = layer(pf_raw, fp["c2w"], in_stats=fs1, in_gamma=fp["bn1g"], in_beta=fp["bn1b"],
                    relu_input=True, collect_stats=True)
    g3, fs3 = layer(g2, fp["c3w"], in_stats=fs2, in_gamma=fp["bn2g"], in_beta=fp["bn2b"],
                    relu_input=True, collect_stats=True)
    # feat bn3 (no relu), max over n == 1 (identity), glob repeat, and the 1088-wide
    # concat with pointfeat are all folded into the K-split head conv1 below.

    # ---------------- segmentation head ----------------
    c1_raw, hs1 = head_conv1(pf_raw, fs1, fp["bn1g"], fp["bn1b"],
                             g3, fs3, fp["bn3g"], fp["bn3b"],
                             hp["c1wp"], hp["c1wg"])
    c2_raw, hs2 = layer(c1_raw, hp["c2w"], in_stats=hs1, in_gamma=hp["bn1g"],
                        in_beta=hp["bn1b"], relu_input=True, collect_stats=True)
    c3_raw, hs3 = layer(c2_raw, hp["c3w"], in_stats=hs2, in_gamma=hp["bn2g"],
                        in_beta=hp["bn2b"], relu_input=True, collect_stats=True)
    logp = layer(c3_raw, hp["c4w"], bias=hp["c4b"],
                 in_stats=hs3, in_gamma=hp["bn3g"], in_beta=hp["bn3b"],
                 relu_input=True, final_log_softmax=True)          # (P, k) log-probs

    out = logp.reshape(b, t, k_classes)                            # (batchsize, n_pts, k)
    return out, trans.reshape(b * t, 3, 3), None


# ----------------------------------------------------------------------------- main

if __name__ == "__main__":
    key = jax.random.PRNGKey(0)
    kx, kp = jax.random.split(key)

    b, t, n = 2, 16, 1                      # input: (batch=2, C=3, n_pts=16, 1)
    x = jax.random.normal(kx, (b, 3, t, n), dtype=jnp.float32)
    params = init_params(kp, k_classes=2)

    out, trans, trans_feat = pointnet_densecls_forward(params, x, k_classes=2)
    jax.block_until_ready(out)
    jax.block_until_ready(trans)

    assert out.shape == (b, t, 2)
    assert trans.shape == (b * t, 3, 3)
    assert trans_feat is None
    print("KERNEL_OK")
</pallas_src>

<mosaic_0001>
module attributes {stable_mosaic.version = 11 : i64} {
  func.func @_layer_kernel(%arg0: i32, %arg1: memref<32x3xf32, #tpu.memory_space<vmem>>, %arg2: memref<3x64xf32, #tpu.memory_space<vmem>>, %arg3: memref<32x64xf32, #tpu.memory_space<vmem>>, %arg4: memref<2x64xf32, #tpu.memory_space<vmem>>) attributes {dimension_semantics = [#tpu.dimension_semantics<arbitrary>], iteration_bounds = array<i64: 1>, scalar_prefetch = 0 : i64, scratch_operands = 0 : i64, tpu.core_type = #tpu.core_type<tc>, window_params = [{transform_indices = @transform_0, window_bounds = array<i64: 32, 3>}, {pipeline_mode = #tpu.pipeline_mode<synchronous>, transform_indices = @transform_1, window_bounds = array<i64: 3, 64>}, {transform_indices = @transform_2, window_bounds = array<i64: 32, 64>}, {pipeline_mode = #tpu.pipeline_mode<synchronous>, transform_indices = @transform_3, window_bounds = array<i64: 2, 64>}]} {
    %c0 = arith.constant 0 : index
    %c0_0 = arith.constant 0 : index
    %0 = vector.load %arg1[%c0, %c0_0] : memref<32x3xf32, #tpu.memory_space<vmem>>, vector<32x3xf32>
    %c0_1 = arith.constant 0 : index
    %c0_2 = arith.constant 0 : index
    %1 = vector.load %arg2[%c0_1, %c0_2] : memref<3x64xf32, #tpu.memory_space<vmem>>, vector<3x64xf32>
    %2 = vector.extract_strided_slice %0 {offsets = [0, 0], sizes = [32, 1], strides = [1, 1]} : vector<32x3xf32> to vector<32x1xf32>
    %3 = vector.extract_strided_slice %1 {offsets = [0, 0], sizes = [1, 64], strides = [1, 1]} : vector<3x64xf32> to vector<1x64xf32>
    %4 = vector.broadcast %2 : vector<32x1xf32> to vector<32x64xf32>
    %5 = vector.broadcast %3 : vector<1x64xf32> to vector<32x64xf32>
    %6 = arith.mulf %4, %5 : vector<32x64xf32>
    %7 = vector.extract_strided_slice %0 {offsets = [0, 1], sizes = [32, 1], strides = [1, 1]} : vector<32x3xf32> to vector<32x1xf32>
    %8 = vector.extract_strided_slice %1 {offsets = [1, 0], sizes = [1, 64], strides = [1, 1]} : vector<3x64xf32> to vector<1x64xf32>
    %9 = vector.broadcast %7 : vector<32x1xf32> to vector<32x64xf32>
    %10 = vector.broadcast %8 : vector<1x64xf32> to vector<32x64xf32>
    %11 = arith.mulf %9, %10 : vector<32x64xf32>
    %12 = arith.addf %6, %11 : vector<32x64xf32>
    %13 = vector.extract_strided_slice %0 {offsets = [0, 2], sizes = [32, 1], strides = [1, 1]} : vector<32x3xf32> to vector<32x1xf32>
    %14 = vector.extract_strided_slice %1 {offsets = [2, 0], sizes = [1, 64], strides = [1, 1]} : vector<3x64xf32> to vector<1x64xf32>
    %15 = vector.broadcast %13 : vector<32x1xf32> to vector<32x64xf32>
    %16 = vector.broadcast %14 : vector<1x64xf32> to vector<32x64xf32>
    %17 = arith.mulf %15, %16 : vector<32x64xf32>
    %18 = arith.addf %12, %17 : vector<32x64xf32>
    %c0_3 = arith.constant 0 : index
    %c0_4 = arith.constant 0 : index
    %19 = vector.load %arg3[%c0_3, %c0_4] : memref<32x64xf32, #tpu.memory_space<vmem>>, vector<32x64xf32>
    tpu.vector_store %arg3[%c0_3, %c0_4], %18 {strides = array<i32>} : memref<32x64xf32, #tpu.memory_space<vmem>>, vector<32x64xf32>,
    %cst = arith.constant dense<0.000000e+00> : vector<64xf32>
    %20 = vector.multi_reduction <add>, %18, %cst [0] : vector<32x64xf32> to vector<64xf32>
    %21 = vector.shape_cast %20 : vector<64xf32> to vector<1x64xf32>
    %22 = arith.mulf %18, %18 : vector<32x64xf32>
    %cst_5 = arith.constant dense<0.000000e+00> : vector<64xf32>
    %23 = vector.multi_reduction <add>, %22, %cst_5 [0] : vector<32x64xf32> to vector<64xf32>
    %24 = vector.shape_cast %23 : vector<64xf32> to vector<1x64xf32>
    %25 = tpu.concatenate %21, %24 in 0 : vector<1x64xf32>, vector<1x64xf32> -> vector<2x64xf32>
    %c0_i32 = arith.constant 0 : i32
    %26 = arith.cmpi eq, %arg0, %c0_i32 : i32
    %27 = arith.extui %26 : i1 to i32
    %c0_i32_6 = arith.constant 0 : i32
    %28 = arith.cmpi ne, %27, %c0_i32_6 : i32
    scf.if %28 {
      %c0_9 = arith.constant 0 : index
      %c0_10 = arith.constant 0 : index
      %32 = vector.load %arg4[%c0_9, %c0_10] : memref<2x64xf32, #tpu.memory_space<vmem>>, vector<2x64xf32>
      tpu.vector_store %arg4[%c0_9, %c0_10], %25 {strides = array<i32>} : memref<2x64xf32, #tpu.memory_space<vmem>>, vector<2x64xf32>,
    } else {
    }
    %c0_i32_7 = arith.constant 0 : i32
    %29 = arith.cmpi ne, %arg0, %c0_i32_7 : i32
    %30 = arith.extui %29 : i1 to i32
    %c0_i32_8 = arith.constant 0 : i32
    %31 = arith.cmpi ne, %30, %c0_i32_8 : i32
    scf.if %31 {
      %c0_9 = arith.constant 0 : index
      %c0_10 = arith.constant 0 : index
      %32 = vector.load %arg4[%c0_9, %c0_10] : memref<2x64xf32, #tpu.memory_space<vmem>>, vector<2x64xf32>
      %33 = arith.addf %32, %25 : vector<2x64xf32>
      %c0_11 = arith.constant 0 : index
      %c0_12 = arith.constant 0 : index
      %34 = vector.load %arg4[%c0_11, %c0_12] : memref<2x64xf32, #tpu.memory_space<vmem>>, vector<2x64xf32>
      tpu.vector_store %arg4[%c0_11, %c0_12], %33 {strides = array<i32>} : memref<2x64xf32, #tpu.memory_space<vmem>>, vector<2x64xf32>,
    } else {
    }
    return
  }
  func.func @transform_0(%arg0: i32) -> (i32, i32) {
    %c0_i32 = arith.constant 0 : i32
    %c0_i32_0 = arith.constant 0 : i32
    return %arg0, %c0_i32 : i32, i32
  }
  func.func @transform_1(%arg0: i32) -> (i32, i32) {
    %c0_i32 = arith.constant 0 : i32
    %c0_i32_0 = arith.constant 0 : i32
    %c0_i32_1 = arith.constant 0 : i32
    return %c0_i32, %c0_i32_0 : i32, i32
  }
  func.func @transform_2(%arg0: i32) -> (i32, i32) {
    %c0_i32 = arith.constant 0 : i32
    %c0_i32_0 = arith.constant 0 : i32
    return %arg0, %c0_i32 : i32, i32
  }
  func.func @transform_3(%arg0: i32) -> (i32, i32) {
    %c0_i32 = arith.constant 0 : i32
    %c0_i32_0 = arith.constant 0 : i32
    %c0_i32_1 = arith.constant 0 : i32
    return %c0_i32, %c0_i32_0 : i32, i32
  }
}

</mosaic_0001>

<bundles_post_ra>
// kernel: tpu_custom_call.1
= control target key start
LH: loop header
LB: loop body
LE: loop exit
PB: predicated region body
PF: predicated region fallthrough
CT: control target
= control target key end

     0   :  { %9 = vsyncpa [#allocation3], 0  ;;  %v244_v1 = vmov 1   ;;  %v245_v2 = vmov 0   ;;  %s304_s0 = inlined_call_operand.vmem [shape: f32[32,3], index: 0, kind: input, shape index: {}]   ;;  %s305_s1 = inlined_call_operand.vmem [shape: f32[3,64], index: 1, kind: input, shape index: {}]   ;;  %s306_s2 = inlined_call_operand.hbm [shape: f32[32,64], index: 2, kind: output, shape index: {0}]   ;;  %s307_s3 = inlined_call_operand.hbm [shape: f32[2,64], index: 3, kind: output, shape index: {1}]  }
   0x1   :  { %v15_v0 = vld [vmem:[%s304_s0] sm:$0xff]  ;;  %193 = vset.pattern.permute.xlu1 %v244_v1  ;;  %192 = vset.pattern.permute.xlu0 %v245_v2 }
   0x2   :  { %10 = vsyncpa [#allocation5], 0  ;;  %49 = vperm.xlu1 %193, %v15_v0   ;;  %22 = vperm.xlu0 %192, %v15_v0   ;;  %v16_v3 = vld [vmem:[%s304_s0 + $0x8] sm:$0xff]  ;;  %v17_v4 = vld [vmem:[%s304_s0 + $0x10] sm:$0xff]  ;;  %v246_v5 = vmov 2   ;;  %v40_v7 = vlaneseq  ;;  %vm104_vm0 = vcmask 523264  }
   0x3   :  { %v18_v6 = vld [vmem:[%s304_s0 + $0x18] sm:$0xff]  ;;  %v19_v13 = vld [vmem:[%s305_s1] sm:$0x7]  ;;  %s247_s0 = smov [#allocation2]  }
   0x4   :  { %v41_v8 = vshrl.u32 %v40_v7, 7  ;;  %s160_s1 = sshll.u32 %s247_s0, 4  ;;  %s161_s1 = int_to_ptr.vmem [resolvable:$true] %s160_s1 }
   0x5   :  { %s200_s22 = scalar_lea.vmem %s161_s1, 512  ;;  %p205_p1 = scmp.lt.s32.totalorder %s161_s1, %s161_s1 }
   0x6   :  { %53 = vperm.xlu1 %193, %v16_v3   ;;  %27 = vperm.xlu0 %192, %v16_v3   ;;  %v66_v11 = vsub.s32 1, %v41_v8  ;;  %v42_v12 = vsub.s32 0, %v41_v8  ;;  %v94_v16 = vsub.s32 2, %v41_v8  ;;  %p201_p0 = scmp.ne.s32.totalorder %s161_s1, %s200_s22  ;;  %p206_p2 = scmp.lt.s32.totalorder %s200_s22, %s200_s22 }
   0x8   :  { %v67_v17 = vrot.slane %v19_v13, %v66_v11  ;;  %v43_v18 = vrot.slane %v19_v13, %v42_v12  ;;  %v95_v21 = vrot.slane %v19_v13, %v94_v16  ;;  %p207_p3 = por %p206_p2, %p205_p1 }
   0xa   :  { %57 = vperm.xlu1 %193, %v17_v4   ;;  %32 = vperm.xlu0 %192, %v17_v4   ;;  %p208_p4 = pnand %p207_p3, %p201_p0 }
   0xe   :  { %195 = vset.pattern.permute.xlu1 %v246_v5  ;;  %194 = vset.pattern.permute.xlu0 %v246_v5 }
   0xf   :  { %81 = vperm.xlu1 %195, %v16_v3   ;;  %77 = vperm.xlu0 %194, %v15_v0  }
  0x13   :  { %196 = vset.pattern.permute.xlu1 %v245_v2  ;;  %197 = vset.pattern.permute.xlu0 %v244_v1 }
  0x14   :  { %37 = vperm.xlu1 %196, %v18_v6   ;;  %61 = vperm.xlu0 %197, %v18_v6  }
  0x18   :  { %198 = vset.pattern.permute.xlu1 %v246_v5  ;;  %199 = vset.pattern.permute.xlu0 %v246_v5 }
  0x19   :  { %85 = vperm.xlu1 %198, %v17_v4  }
  0x1d   :  { %89 = vperm.xlu1 %198, %v18_v6  }
  0x7d   :  { %v50_v9 = vpop.permute.xlu1 %49  ;;  %v23_v10 = vpop.permute.xlu0 %22 }
  0x7e   :  { %v68_v22 = vmul.f32 %v67_v17, %v50_v9  ;;  %v44_v23 = vmul.f32 %v43_v18, %v23_v10 }
  0x80   :  { %v72_v28 = vadd.f32 %v68_v22, %v44_v23 }
  0x81   :  { %v54_v14 = vpop.permute.xlu1 %53  ;;  %v28_v15 = vpop.permute.xlu0 %27 }
  0x82   :  { %v69_v24 = vmul.f32 %v67_v17, %v54_v14  ;;  %v45_v25 = vmul.f32 %v43_v18, %v28_v15 }
  0x84   :  { %v73_v29 = vadd.f32 %v69_v24, %v45_v25 }
  0x85   :  { %v58_v19 = vpop.permute.xlu1 %57  ;;  %v33_v20 = vpop.permute.xlu0 %32 }
  0x86   :  { %v70_v35 = vmul.f32 %v67_v17, %v58_v19  ;;  %v46_v36 = vmul.f32 %v43_v18, %v33_v20 }
  0x88   :  { %v74_v41 = vadd.f32 %v70_v35, %v46_v36 }
  0x8a   :  { %v82_v26 = vpop.permute.xlu1 %81  ;;  %v78_v27 = vpop.permute.xlu0 %77 }
  0x8b   :  { %v97_v30 = vmul.f32 %v95_v21, %v82_v26  ;;  %v96_v31 = vmul.f32 %v95_v21, %v78_v27 }
  0x8d   :  { %v101_v32 = vadd.f32 %v97_v30, %v73_v29  ;;  %v100_v33 = vadd.f32 %v96_v31, %v72_v28 }
  0x8f   :  { %106 = vst.msk [vmem:[#allocation2 + $0x8] sm:$0xff] %vm104_vm0, %v101_v32  ;;  %105 = vst.msk [vmem:[#allocation2] sm:$0xff] %vm104_vm0, %v100_v33  ;;  %v38_v34 = vpop.permute.xlu1 %37  ;;  %v62_v37 = vpop.permute.xlu0 %61  ;;  %v123_v38 = vmul.f32 %v101_v32, %v101_v32  ;;  %v122_v39 = vmul.f32 %v100_v33, %v100_v33  ;;  %v110_v45 = vsel %vm104_vm0, %v101_v32, 0.0  ;;  %v109_v46 = vsel %vm104_vm0, %v100_v33, 0.0 }
  0x90   :  { %v47_v42 = vmul.f32 %v43_v18, %v38_v34  ;;  %v71_v43 = vmul.f32 %v67_v17, %v62_v37  ;;  %v111_v55 = vadd.f32 %v110_v45, %v109_v46 }
  0x91   :  { %v127_v48 = vsel %vm104_vm0, %v123_v38, 0.0  ;;  %v126_v49 = vsel %vm104_vm0, %v122_v39, 0.0 }
  0x92   :  { %v75_v51 = vadd.f32 %v71_v43, %v47_v42  ;;  %v128_v58 = vadd.f32 %v127_v48, %v126_v49 }
  0x94   :  { %v86_v40 = vpop.permute.xlu1 %85 }
  0x95   :  { %v98_v44 = vmul.f32 %v95_v21, %v86_v40 }
  0x97   :  { %v102_v47 = vadd.f32 %v98_v44, %v74_v41 }
  0x98   :  { %v90_v50 = vpop.permute.xlu1 %89 }
  0x99   :  { %107 = vst.msk [vmem:[#allocation2 + $0x10] sm:$0xff] %vm104_vm0, %v102_v47  ;;  %v112_v52 = vsel %vm104_vm0, %v102_v47, 0.0  ;;  %v124_v53 = vmul.f32 %v102_v47, %v102_v47  ;;  %v99_v54 = vmul.f32 %v95_v21, %v90_v50 }
  0x9a   :  { %v113_v59 = vadd.f32 %v112_v52, %v111_v55 }
  0x9b   :  { %v129_v56 = vsel %vm104_vm0, %v124_v53, 0.0  ;;  %v103_v57 = vadd.f32 %v99_v54, %v75_v51 }
  0x9c   :  { %v130_v62 = vadd.f32 %v129_v56, %v128_v58 }
  0x9d   :  { %108 = vst.msk [vmem:[#allocation2 + $0x18] sm:$0xff] %vm104_vm0, %v103_v57  ;;  %v114_v60 = vsel %vm104_vm0, %v103_v57, 0.0  ;;  %v125_v61 = vmul.f32 %v103_v57, %v103_v57 }
  0x9e   :  { %v115_v63 = vadd.f32 %v114_v60, %v113_v59 }
  0x9f   :  { %211 = shalt.err (!%p208_p4)
}
  0xa0   :  { %s248_s23 = smov 128   ;;  %s249_s24 = smov 8   ;;  %v131_v0 = vsel %vm104_vm0, %v125_v61, 0.0  ;;  %v116_v1 = vrot.slane %v115_v63, 4  ;;  %vm139_vm1 = vcmask 1040384   ;;  %vm145_vm2 = vcmask 517120  }
  0xa1   :  { %166 = dma.vmem_to_hbm [thread:$0]  %s161_s1, 512, %s306_s2, [#allocation3], %s248_s23, %s248_s23, %s249_s24   ;;  %v132_v2 = vadd.f32 %v131_v0, %v130_v62 }
  0xa2   :  { %v117_v3 = vadd.f32 %v116_v1, %v115_v63  ;;  %s250_s27 = smov [#allocation4]  }
  0xa3   :  { %v133_v4 = vrot.slane %v132_v2, 4  ;;  %s173_s28 = sshll.u32 %s250_s27, 4  ;;  %s174_s28 = int_to_ptr.vmem [resolvable:$true] %s173_s28 }
  0xa4   :  { %v118_v5 = vrot.slane %v117_v3, 2  ;;  %s220_s2 = scalar_lea.vmem %s174_s28, 32  ;;  %p225_p6 = scmp.lt.s32.totalorder %s174_s28, %s174_s28 }
  0xa5   :  { %v134_v6 = vadd.f32 %v133_v4, %v132_v2  ;;  %p221_p5 = scmp.ne.s32.totalorder %s174_s28, %s220_s2  ;;  %p226_p7 = scmp.lt.s32.totalorder %s220_s2, %s220_s2 }
  0xa6   :  { %v119_v7 = vadd.f32 %v118_v5, %v117_v3 }
  0xa7   :  { %v135_v8 = vrot.slane %v134_v6, 2  ;;  %p227_p8 = por %p226_p7, %p225_p6 }
  0xa8   :  { %v120_v9 = vrot.slane %v119_v7, 1 }
  0xa9   :  { %v136_v10 = vadd.f32 %v135_v8, %v134_v6  ;;  %p228_p9 = pnand %p227_p8, %p221_p5 }
  0xaa   :  { %v121_v12 = vadd.f32 %v120_v9, %v119_v7 }
  0xab   :  { %v137_v11 = vrot.slane %v136_v10, 1 }
  0xad   :  { %v138_v13 = vadd.f32 %v137_v11, %v136_v10 }
  0xaf   :  { %v140_v14 = vsel %vm139_vm1, %v121_v12, %v138_v13 }
  0xb0   :  { %146 = vst.msk [vmem:[#allocation4] sm:$0x3] %vm145_vm2, %v140_v14 }
  0xb1   :  { %231 = shalt.err (!%p228_p9)
}
  0xb2   :  { %176 = dma.vmem_to_hbm [thread:$0]  %s174_s28, 32, %s307_s3, [#allocation5]  }
  0xb3   :  { %240 = dma.done.wait [#allocation3], 512  }
  0xb4   :  { %241 = vsyncadd [#allocation3], 4294966784 }
  0xb5   :  { %242 = dma.done.wait [#allocation5], 32  }
  0xb6   :  { %243 = vsyncadd [#allocation5], 4294967264 }
  0xb7   :  { %183 = vsyncpa [#allocation3], 1 }
  0xb8   :  { %184 = vsyncpa [#allocation5], 1 }

</bundles_post_ra>
